<compile_context>
chip_gen: v7x
topology: tpu7x:2x2x1
jax: 0.10.0
libtpu: 0.0.40
codegen_flags: <defaults>
</compile_context>

<pallas_src>
import functools
import math

import jax
import jax.numpy as jnp
import numpy as np
from jax.experimental import pallas as pl
from jax.experimental.pallas import tpu as pltpu

# ----------------------------- dataset constants -----------------------------
_CMS_TABLES = {
    "coco": [703, 15100.0, 22519.0, 15179.0, 8853.0, 5334.0, 3025.0, 1803.0,
             971.0, 541.0, 280.0, 145, 69, 32, 11, 7, 2, 0, 1, 0, 0],
    "voc": [2538.0, 1479.0, 386.0, 91.0, 10.0, 4.0, 1.0, 0, 0, 0, 0, 0, 0, 0,
            0, 0, 0, 0, 0, 0],
    "ade20k": [104.0, 507.0, 1177.0, 1747.0, 1909.0, 1926.0, 1765.0, 1646.0,
               1468.0, 1289.0, 1111, 874, 624, 579, 416, 258, 226, 159, 113,
               95, 64, 48, 27, 21, 8, 9, 4, 1, 0, 0, 1],
    "recipe1m": [0.0, 11570.0, 27383.0, 45583.0, 62422.0, 72228.0, 76909.0,
                 76319.0, 70102.0, 59216.0, 46648.0, 34192.0, 23283.0, 15590.0,
                 10079.0, 6240.0, 3769.0, 2211.0, 1343.0, 27.0],
}
# used for 'nuswide' and any other dataset name (matches the PyTorch `else`)
_CMS_DEFAULT = [36340, 42824.0, 28406.0, 17843.0, 11093.0, 6550.0, 3564.0,
                1768.0, 647.0, 164.0, 40.0, 3, 2, 0, 0, 0, 0, 0, 0, 0, 0]


def _get_cms(dataset, K):
    table = _CMS_TABLES.get(dataset, _CMS_DEFAULT)
    assert K <= len(table), f"K={K} exceeds cms table for dataset={dataset}"
    cms = np.asarray(table, dtype=np.float64)[:K]
    return cms.astype(np.float32), float(cms.sum())


def _round_up(n, m):
    return ((n + m - 1) // m) * m


def _arch_params():
    """(max_tb, vmem_limit_bytes) chosen per TPU generation (safe fallback)."""
    kind = ""
    try:
        kind = jax.devices()[0].device_kind.lower()
    except Exception:
        pass
    if "v5" in kind or "v6" in kind:
        # 128 MiB physical VMEM: big tiles + generous scoped limit.
        return 16384, 96 * 1024 * 1024
    # v7x (64 MiB per TC) and unknown targets: conservative.
    return 8192, 48 * 1024 * 1024


def _choose_tile(B, itemsize, max_tb):
    """Pick a sublane-aligned batch tile; B need NOT be a multiple of it."""
    sub = max(8, 32 // max(1, itemsize))      # 8 for f32, 16 for bf16, 32 for i8
    if B <= 256:
        return _round_up(B, sub)              # single small tile
    # >= 2 grid steps so v7x can shard the 'parallel' axis on both TCs.
    return min(max_tb, _round_up(pl.cdiv(B, 2), 128))


# --------------------------------- kernel ------------------------------------
def _dc_loss_kernel(x_ref, t_ref, cms_ref, o_ref, *, c, U, offset, e):
    x = x_ref[...].astype(jnp.float32)               # (tb, K); cast in-kernel
    tb, k = x.shape

    t_row = t_ref[0]                                 # (1, tb) int32, lane-dense
    cms_row = cms_ref[...]                           # (1, K)  f32

    # ---- wide (tb, K) stage: lane reductions + masked gather (no one-hot) ----
    row_sum = jnp.sum(x, axis=-1, keepdims=True)     # (tb, 1)
    t_col = jnp.transpose(t_row)                     # (tb, 1) int32 (XLU flip)
    col = jax.lax.broadcasted_iota(jnp.int32, (1, k), 1)    # (1, K) int32
    num_t = jnp.sum(jnp.where(col == t_col, x + cms_row, 0.0),
                    axis=-1, keepdims=True)          # (tb, 1)

    # ---- thin per-row math runs lane-dense: two thin XLU transposes, then ----
    # ---- divide/log/mul/add at full 128-lane utilization in (1, tb).      ----
    num_row = jnp.transpose(num_t)                   # (1, tb)
    den_row = jnp.transpose(row_sum) + c             # (1, tb)
    dc = num_row / den_row
    loss = -jnp.log(dc + e) - (t_row.astype(jnp.float32) + offset) * U

    o_ref[0] = loss                                  # (1, tb) lane-dense store


# -------------------------------- wrapper -------------------------------------
def dc_loss(x, target, *, U_param, dataset="coco", reduction="none", e=1e-8,
            min_pallas_batch=512):
    """Pallas implementation of DCLoss.forward."""
    assert reduction in ("none", "mean")
    B, K = x.shape

    cms_np, c = _get_cms(dataset, K)
    U = math.log(U_param)
    offset = 0.0 if dataset in ("coco", "nuswide") else 1.0

    if B < min_pallas_batch:
        # Tiny batches: fused XLA expression beats a kernel launch.
        loss = _dc_loss_ref(x, target, U_param=U_param, dataset=dataset, e=e)
    else:
        max_tb, vmem_limit = _arch_params()
        tb = _choose_tile(B, jnp.dtype(x.dtype).itemsize, max_tb)
        grid = pl.cdiv(B, tb)

        # x is passed through untouched (no wrapper-side cast / pad -> no extra
        # full HBM passes). Only the tiny (B,) target gets padded so it can be
        # reshaped into lane-dense (grid, 1, tb) rows.
        tp = target.astype(jnp.int32)
        pad = grid * tb - B
        if pad:
            tp = jnp.pad(tp, (0, pad))
        t3 = tp.reshape(grid, 1, tb)
        cms_arr = jnp.asarray(cms_np).reshape(1, K)  # input, not a captured const

        out = pl.pallas_call(
            functools.partial(_dc_loss_kernel, c=c, U=U, offset=offset, e=e),
            out_shape=jax.ShapeDtypeStruct((grid, 1, tb), jnp.float32),
            grid=(grid,),
            in_specs=[
                # ragged last block allowed: garbage rows are sliced off below
                pl.BlockSpec((tb, K), lambda i: (i, 0)),
                pl.BlockSpec((1, 1, tb), lambda i: (i, 0, 0)),   # targets
                pl.BlockSpec((1, K), lambda i: (0, 0)),          # cms (resident)
            ],
            out_specs=pl.BlockSpec((1, 1, tb), lambda i: (i, 0, 0)),
            compiler_params=pltpu.CompilerParams(
                dimension_semantics=("parallel",),
                vmem_limit_bytes=vmem_limit),
        )(x, t3, cms_arr)

        # drop padded / ragged-block rows BEFORE any reduction
        loss = out.reshape(-1)[:B]

    if reduction == "mean":
        loss = loss.mean()
    return loss


# ------------------------------- reference ------------------------------------
def _dc_loss_ref(x, target, *, U_param, dataset="coco", e=1e-8):
    B, K = x.shape
    cms_np, c = _get_cms(dataset, K)
    cms = jnp.asarray(cms_np)
    U = math.log(U_param)
    offset = 0.0 if dataset in ("coco", "nuswide") else 1.0
    xf = x.astype(jnp.float32)
    row_sum = xf.sum(axis=-1)
    picked = xf[jnp.arange(B), target] + cms[target]
    dc = picked / (row_sum + c)
    return -jnp.log(dc + e) - (target.astype(jnp.float32) + offset) * U


# --------------------------------- main ---------------------------------------
if __name__ == "__main__":
    k1, k2, k3, k4 = jax.random.split(jax.random.PRNGKey(0), 4)

    # Test 1: tiny batch (single exact tile), coco, reduction='none'.
    B, K = 8, 16
    x = jax.random.uniform(k1, (B, K), dtype=jnp.float32, minval=0.1, maxval=5.0)
    t = jax.random.randint(k2, (B,), 0, K, dtype=jnp.int32)
    loss = jax.block_until_ready(dc_loss(x, t, U_param=2.0, dataset="coco",
                                         reduction="none", min_pallas_batch=0))
    ref = _dc_loss_ref(x, t, U_param=2.0, dataset="coco")
    np.testing.assert_allclose(np.asarray(loss), np.asarray(ref),
                               rtol=1e-5, atol=1e-5)

    # Test 2: 2-step 'parallel' grid with a ragged last x block (no x padding),
    # voc offset path, reduction='mean'.
    B2, K2 = 300, 20
    x2 = jax.random.uniform(k3, (B2, K2), dtype=jnp.float32, minval=0.1,
                            maxval=5.0)
    t2 = jax.random.randint(k4, (B2,), 0, K2, dtype=jnp.int32)
    loss2 = jax.block_until_ready(dc_loss(x2, t2, U_param=3.0, dataset="voc",
                                          reduction="mean", min_pallas_batch=0))
    ref2 = _dc_loss_ref(x2, t2, U_param=3.0, dataset="voc").mean()
    np.testing.assert_allclose(np.asarray(loss2), np.asarray(ref2),
                               rtol=1e-5, atol=1e-5)

    print("KERNEL_OK")
</pallas_src>

<mosaic_0001>
module attributes {stable_mosaic.version = 11 : i64} {
  func.func @_dc_loss_kernel(%arg0: i32, %arg1: memref<8x16xf32, #tpu.memory_space<vmem>>, %arg2: memref<1x1x8xi32, #tpu.memory_space<vmem>>, %arg3: memref<1x16xf32, #tpu.memory_space<vmem>>, %arg4: memref<1x1x8xf32, #tpu.memory_space<vmem>>) attributes {dimension_semantics = [#tpu.dimension_semantics<parallel>], iteration_bounds = array<i64: 1>, scalar_prefetch = 0 : i64, scratch_operands = 0 : i64, tpu.core_type = #tpu.core_type<tc>, window_params = [{transform_indices = @transform_0, window_bounds = array<i64: 8, 16>}, {transform_indices = @transform_1, window_bounds = array<i64: 1, 1, 8>}, {pipeline_mode = #tpu.pipeline_mode<synchronous>, transform_indices = @transform_2, window_bounds = array<i64: 1, 16>}, {transform_indices = @transform_3, window_bounds = array<i64: 1, 1, 8>}]} {
    %c0 = arith.constant 0 : index
    %c0_0 = arith.constant 0 : index
    %0 = vector.load %arg1[%c0, %c0_0] : memref<8x16xf32, #tpu.memory_space<vmem>>, vector<8x16xf32>
    %c0_1 = arith.constant 0 : index
    %c0_2 = arith.constant 0 : index
    %c0_3 = arith.constant 0 : index
    %1 = vector.load %arg2[%c0_1, %c0_2, %c0_3] : memref<1x1x8xi32, #tpu.memory_space<vmem>>, vector<1x1x8xi32>
    %2 = vector.shape_cast %1 : vector<1x1x8xi32> to vector<1x8xi32>
    %c0_4 = arith.constant 0 : index
    %c0_5 = arith.constant 0 : index
    %3 = vector.load %arg3[%c0_4, %c0_5] : memref<1x16xf32, #tpu.memory_space<vmem>>, vector<1x16xf32>
    %cst = arith.constant dense<0.000000e+00> : vector<8xf32>
    %4 = vector.multi_reduction <add>, %0, %cst [1] : vector<8x16xf32> to vector<8xf32>
    %5 = vector.shape_cast %4 : vector<8xf32> to vector<8x1xf32>
    %6 = tpu.transpose %2, [1, 0] : vector<1x8xi32> -> vector<8x1xi32>
    %7 = tpu.iota {dimensions = array<i32: 1>} : vector<1x16xi32>
    %8 = vector.broadcast %7 : vector<1x16xi32> to vector<8x16xi32>
    %9 = vector.broadcast %6 : vector<8x1xi32> to vector<8x16xi32>
    %10 = arith.cmpi eq, %8, %9 : vector<8x16xi32>
    %11 = vector.broadcast %3 : vector<1x16xf32> to vector<8x16xf32>
    %12 = arith.addf %0, %11 : vector<8x16xf32>
    %cst_6 = arith.constant 0.000000e+00 : f32
    %13 = vector.broadcast %cst_6 : f32 to vector<8x16xf32>
    %14 = arith.select %10, %12, %13 : vector<8x16xi1>, vector<8x16xf32>
    %cst_7 = arith.constant dense<0.000000e+00> : vector<8xf32>
    %15 = vector.multi_reduction <add>, %14, %cst_7 [1] : vector<8x16xf32> to vector<8xf32>
    %16 = vector.shape_cast %15 : vector<8xf32> to vector<8x1xf32>
    %17 = tpu.transpose %16, [1, 0] : vector<8x1xf32> -> vector<1x8xf32>
    %18 = tpu.transpose %5, [1, 0] : vector<8x1xf32> -> vector<1x8xf32>
    %cst_8 = arith.constant 7.457200e+04 : f32
    %19 = vector.broadcast %cst_8 : f32 to vector<1x8xf32>
    %20 = arith.addf %18, %19 : vector<1x8xf32>
    %21 = arith.divf %17, %20 : vector<1x8xf32>
    %cst_9 = arith.constant 9.99999993E-9 : f32
    %22 = vector.broadcast %cst_9 : f32 to vector<1x8xf32>
    %23 = arith.addf %21, %22 : vector<1x8xf32>
    %24 = math.log %23 : vector<1x8xf32>
    %cst_10 = arith.constant 0.000000e+00 : f32
    %25 = vector.broadcast %cst_10 : f32 to vector<1x8xf32>
    %26 = arith.subf %25, %24 : vector<1x8xf32>
    %27 = arith.sitofp %2 : vector<1x8xi32> to vector<1x8xf32>
    %cst_11 = arith.constant 0.000000e+00 : f32
    %28 = vector.broadcast %cst_11 : f32 to vector<1x8xf32>
    %29 = arith.addf %27, %28 : vector<1x8xf32>
    %cst_12 = arith.constant 0.693147182 : f32
    %30 = vector.broadcast %cst_12 : f32 to vector<1x8xf32>
    %31 = arith.mulf %29, %30 : vector<1x8xf32>
    %32 = arith.subf %26, %31 : vector<1x8xf32>
    %c0_13 = arith.constant 0 : index
    %c0_14 = arith.constant 0 : index
    %c0_15 = arith.constant 0 : index
    %33 = vector.load %arg4[%c0_13, %c0_14, %c0_15] : memref<1x1x8xf32, #tpu.memory_space<vmem>>, vector<1x1x8xf32>
    %34 = vector.shape_cast %33 : vector<1x1x8xf32> to vector<1x8xf32>
    %35 = vector.shape_cast %32 : vector<1x8xf32> to vector<1x1x8xf32>
    tpu.vector_store %arg4[%c0_13, %c0_14, %c0_15], %35 {strides = array<i32>} : memref<1x1x8xf32, #tpu.memory_space<vmem>>, vector<1x1x8xf32>,
    return
  }
  func.func @transform_0(%arg0: i32) -> (i32, i32) {
    %c0_i32 = arith.constant 0 : i32
    %c0_i32_0 = arith.constant 0 : i32
    return %arg0, %c0_i32 : i32, i32
  }
  func.func @transform_1(%arg0: i32) -> (i32, i32, i32) {
    %c0_i32 = arith.constant 0 : i32
    %c0_i32_0 = arith.constant 0 : i32
    %c0_i32_1 = arith.constant 0 : i32
    return %arg0, %c0_i32, %c0_i32_0 : i32, i32, i32
  }
  func.func @transform_2(%arg0: i32) -> (i32, i32) {
    %c0_i32 = arith.constant 0 : i32
    %c0_i32_0 = arith.constant 0 : i32
    %c0_i32_1 = arith.constant 0 : i32
    return %c0_i32, %c0_i32_0 : i32, i32
  }
  func.func @transform_3(%arg0: i32) -> (i32, i32, i32) {
    %c0_i32 = arith.constant 0 : i32
    %c0_i32_0 = arith.constant 0 : i32
    %c0_i32_1 = arith.constant 0 : i32
    return %arg0, %c0_i32, %c0_i32_0 : i32, i32, i32
  }
}

</mosaic_0001>

<bundles_post_ra>
// kernel: tpu_custom_call.1
= control target key start
LH: loop header
LB: loop body
LE: loop exit
PB: predicated region body
PF: predicated region fallthrough
CT: control target
= control target key end

     0   :  { %8 = vsyncpa [#allocation3], 0  ;;  %s286_s0 = inlined_call_operand.hbm [shape: f32[8,16], index: 0, kind: input, shape index: {}]   ;;  %s287_s1 = inlined_call_operand.vmem [shape: s32[1,1,8], index: 1, kind: input, shape index: {}]   ;;  %s288_s2 = inlined_call_operand.vmem [shape: f32[1,16], index: 2, kind: input, shape index: {}]   ;;  %s289_s3 = inlined_call_operand.hbm [shape: f32[1,1,8], index: 3, kind: output, shape index: {}]  }
   0x1   :  { %9 = vsyncpa [#allocation4], 0  ;;  %s233_s12 = smov [#allocation2]   ;;  %s185_s16 = scalar_lea.hbm %s286_s0, 128 }
   0x2   :  { %s16_s13 = sshll.u32 %s233_s12, 4  ;;  %p186_p0 = scmp.ne.s32.totalorder %s286_s0, %s185_s16  ;;  %s17_s13 = int_to_ptr.vmem [resolvable:$true] %s16_s13 }
   0x3   :  { %p189_p1 = scmp.lt.u32.totalorder %s185_s16, %s286_s0 }
   0x5   :  { %p191_p2 = pnand %p189_p1, %p186_p0 }
   0x7   :  { %194 = shalt.err (!%p191_p2)
}
   0x8   :  { %s195_s21 = scalar_lea.vmem %s17_s13, 128  ;;  %p200_p4 = scmp.lt.s32.totalorder %s17_s13, %s17_s13 }
   0x9   :  { %p196_p3 = scmp.ne.s32.totalorder %s17_s13, %s195_s21  ;;  %p201_p5 = scmp.lt.s32.totalorder %s195_s21, %s195_s21 }
   0xb   :  { %p202_p6 = por %p201_p5, %p200_p4 }
   0xd   :  { %p203_p7 = pnand %p202_p6, %p196_p3 }
   0xf   :  { %206 = shalt.err (!%p203_p7)
}
  0x10   :  { %19 = dma.hbm_to_vmem [thread:$0]  %s286_s0, 128, %s17_s13, [#allocation3]  }
  0x11   :  { %229 = dma.done.wait [#allocation3], 128  }
  0x12   :  { %230 = vsyncadd [#allocation3], 4294967168  ;;  %v28_v0 = vld [vmem:[%s287_s1] sm:$0x1]  ;;  %vm30_vm0 = vcmask 130048   ;;  %v234_v3 = vmov 0   ;;  %v66_v5 = vlaneseq }
  0x13   :  { %34 = vxpose.xlu0.b32.start.end [1/1] (short) (narrow) %v28_v0, 8  ;;  %v27_v1 = vld [vmem:[#allocation2] sm:$0xff]  ;;  %v154_v20 = vcvt.s32.f32 %v28_v0  ;;  %s235_s0 = smov [#allocation5]   ;;  %vm158_vm2 = vcmask 57344  }
  0x14   :  { %v31_v2 = vsel %vm30_vm0, %v27_v1, 0.0  ;;  %v175_v6 = vld [vmem:[%s288_s2] ss:$0 sm:$0xff]  ;;  %v67_v7 = vand.u32 127, %v66_v5  ;;  %s166_s1 = sshll.u32 %s235_s0, 4  ;;  %s167_s1 = int_to_ptr.vmem [resolvable:$true] %s166_s1 }
  0x15   :  { %32 = vadd.xlane.f32.xlu1 %v31_v2  ;;  %v78_v8 = vadd.f32 %v175_v6, %v27_v1  ;;  %v156_v22 = vmul.f32 0.6931472, %v154_v20  ;;  %s207_s2 = scalar_lea.vmem %s167_s1, 16  ;;  %s211_s28 = scalar_lea.vmem %s167_s1, 32 }
  0x16   :  { %p208_p8 = scmp.ne.s32.totalorder %s167_s1, %s207_s2  ;;  %p212_p9 = scmp.lt.s32.totalorder %s167_s1, %s167_s1 }
  0x17   :  { %p213_p10 = scmp.lt.s32.totalorder %s211_s28, %s207_s2 }
  0x19   :  { %p214_p11 = por %p213_p10, %p212_p9 }
  0x1b   :  { %p215_p12 = pnand %p214_p11, %p208_p8 }
  0x3c   :  { %180 = vset.pattern.permute.xlu0 %v234_v3 }
  0x93   :  { %v50_v4 = vpop.trf.xlu0 }
  0x94   :  { %69 = vperm.xlu0 %180, %v50_v4  }
  0xa2   :  { %v33_v12 = vpop.xlane.xlu1 %32 }
 0x113   :  { %v70_v9 = vpop.permute.xlu0 %69 }
 0x114   :  { %vm71_vm1 = vcmp.eq.s32.totalorder %v67_v7, %v70_v9 }
 0x115   :  { %v79_v10 = vsel %vm71_vm1, %v78_v8, 0.0 }
 0x116   :  { %v80_v11 = vsel %vm30_vm0, %v79_v10, 0.0 }
 0x117   :  { %81 = vadd.xlane.f32.xlu1 %v80_v11 }
 0x14a   :  { %115 = vxpose.xlu1.b32.start.end [1/1] (short) (narrow) %v33_v12, 8 }
 0x1a4   :  { %v82_v13 = vpop.xlane.xlu1 %81 }
 0x1a5   :  { %83 = vxpose.xlu0.b32.start.end [1/1] (short) (narrow) %v82_v13, 8 }
 0x1ca   :  { %v131_v14 = vpop.trf.xlu1 }
 0x1cb   :  { %v147_v15 = vadd.f32 74572.0, %v131_v14 }
 0x1cd   :  { %181 = vrcp.f32 %v147_v15 }
 0x1d7   :  { %v182_v16 = vpop.eup %181 }
 0x225   :  { %v99_v17 = vpop.trf.xlu0 }
 0x226   :  { %v149_v18 = vmul.f32 %v182_v16, %v99_v17 }
 0x228   :  { %v150_v19 = vadd.f32 1e-08, %v149_v18 }
 0x22a   :  { %183 = vlog2.f32 %v150_v19 }
 0x234   :  { %v184_v21 = vpop.eup %183 }
 0x235   :  { %v152_v23 = vmul.f32 0.6931472, %v184_v21 }
 0x237   :  { %v153_v24 = vsub.f32 0.0, %v152_v23 }
 0x239   :  { %v157_v25 = vsub.f32 %v153_v24, %v156_v22 }
 0x23b   :  { %159 = vst.msk [vmem:[#allocation5] sm:$0x1] %vm158_vm2, %v157_v25 }
 0x23c   :  { %218 = shalt.err (!%p215_p12)
}
 0x23d   :  { %s219_s4 = scalar_lea.hbm %s289_s3, 16 }
 0x23e   :  { %p220_p13 = scmp.ne.s32.totalorder %s289_s3, %s219_s4  ;;  %p223_p0 = scmp.lt.u32.totalorder %s219_s4, %s289_s3 }
 0x240   :  { %p225_p1 = pnand %p223_p0, %p220_p13 }
 0x242   :  { %228 = shalt.err (!%p225_p1)
}
 0x243   :  { %169 = dma.vmem_to_hbm [thread:$0]  %s167_s1, 16, %s289_s3, [#allocation4]  }
 0x244   :  { %231 = dma.done.wait [#allocation4], 16  }
 0x245   :  { %232 = vsyncadd [#allocation4], 4294967280 }
 0x246   :  { %173 = vsyncpa [#allocation3], 1 }
 0x247   :  { %174 = vsyncpa [#allocation4], 1 }

</bundles_post_ra>
